<compile_context>
chip_gen: v5e
topology: v5e:2x2
jax: 0.10.0
libtpu: 0.0.40
codegen_flags: <defaults>
</compile_context>

<pallas_src>
import functools

import jax
import jax.numpy as jnp
from jax import lax
from jax.experimental import pallas as pl
from jax.experimental.pallas import tpu as pltpu


def _round_up(x, m):
    return ((x + m - 1) // m) * m


def _label_smoothing_kernel(pred_ref, target_ref, out_ref, acc_ref, *,
                            classes, smoothing, n_total, tile_n):
    """One (C, TILE_N) tile of rows.

    pred_ref:   (C, TILE_N) VMEM, input dtype (bf16/f32)
    target_ref: (1, TILE_N) VMEM, int32 class ids
    out_ref:    (1, 128)    VMEM f32, per-split partial result in lane 0
    acc_ref:    (1, TILE_N) VMEM f32 scratch, per-row loss accumulator
    """
    i = pl.program_id(1)                      # position along the batch tiles

    @pl.when(i == 0)
    def _init():
        acc_ref[...] = jnp.zeros_like(acc_ref)

    confidence = 1.0 - smoothing
    off_value = smoothing / (classes - 1)

    x = pred_ref[...].astype(jnp.float32)     # (C, TILE_N), upcast in-kernel
    tgt = target_ref[...]                     # (1, TILE_N) int32

    # Unrolled class reductions (classes is a small static int): lane-dense
    # VPU / EUP work only.
    m = x[0:1, :]
    for c in range(1, classes):
        m = jnp.maximum(m, x[c:c + 1, :])     # running max over classes
    shifted = x - m                           # (C, TILE_N)

    sum_exp = jnp.zeros_like(m)
    sum_shift = jnp.zeros_like(m)
    shift_at_t = jnp.zeros_like(m)
    for c in range(classes):
        row = shifted[c:c + 1, :]
        sum_exp = sum_exp + jnp.exp(row)
        sum_shift = sum_shift + row
        shift_at_t = shift_at_t + jnp.where(tgt == c, row, 0.0)

    lse = jnp.log(sum_exp)                    # (1, TILE_N)
    # sum_c logp = sum_c shifted - C*lse ; logp[target] = shifted[target] - lse
    logp_sum = sum_shift - classes * lse
    logp_t = shift_at_t - lse
    per_row = (-(confidence - off_value)) * logp_t - off_value * logp_sum

    # Mask padded / tail rows so they contribute nothing to the mean.
    block = pl.program_id(0) * pl.num_programs(1) + i
    gidx = block * tile_n + lax.broadcasted_iota(jnp.int32, per_row.shape, 1)
    per_row = jnp.where(gidx < n_total, per_row, 0.0)

    acc_ref[...] += per_row                   # element-wise VPU accumulate

    @pl.when(i == pl.num_programs(1) - 1)
    def _finalize():
        # One cross-lane reduce per split; already divided by the true N.
        partial = jnp.sum(acc_ref[...]) / jnp.float32(n_total)
        lane = lax.broadcasted_iota(jnp.int32, (1, 128), 1)
        out_ref[...] = jnp.where(lane == 0, partial, 0.0)


def label_smoothing_loss(pred, target, *, classes=3, smoothing=0.25,
                         tile_n=65536, core_splits=2):
    """pred: (N, C) logits (f32 or bf16); target: (N,) int labels. Returns scalar f32."""
    n, c = pred.shape
    assert c == classes, (c, classes)
    assert classes > 1, "smoothing / (classes - 1) is undefined for classes == 1"
    assert target.shape == (n,)

    # Batch tiles: the lane axis must be a multiple of 128. tile_n=65536 keeps
    # the double-buffered pred+target tiles at ~1 MiB of HBM traffic per step
    # (~10 MiB of VMEM incl. sublane padding), comfortably under the 32 MiB
    # scoped limit we request on every gen, including v7x's 64 MiB VMEM.
    tile = min(int(tile_n), _round_up(n, 128))
    n_pad = _round_up(n, tile * core_splits)
    n_blocks = n_pad // tile
    blocks_per_split = n_blocks // core_splits

    # Lane-dense layout: classes on sublanes, batch rows on lanes. One XLA
    # layout pass (transpose + zero-pad); no dtype cast (upcast is in-kernel).
    # TODO(synk): drop this transpose when the producer emits class-major pred.
    pred_cm = jnp.pad(jnp.transpose(pred), ((0, 0), (0, n_pad - n)))
    tgt = jnp.pad(target.astype(jnp.int32), (0, n_pad - n)).reshape(1, n_pad)

    def in_map(s, i):
        return (0, s * blocks_per_split + i)

    def out_map(s, i):
        return (0, s)

    kernel = functools.partial(
        _label_smoothing_kernel,
        classes=classes, smoothing=float(smoothing), n_total=n, tile_n=tile)

    partials = pl.pallas_call(
        kernel,
        out_shape=jax.ShapeDtypeStruct((1, 128 * core_splits), jnp.float32),
        grid_spec=pltpu.PrefetchScalarGridSpec(
            num_scalar_prefetch=0,
            grid=(core_splits, blocks_per_split),
            in_specs=[
                pl.BlockSpec((classes, tile), in_map),
                pl.BlockSpec((1, tile), in_map),
            ],
            out_specs=pl.BlockSpec((1, 128), out_map),
            scratch_shapes=[pltpu.VMEM((1, tile), jnp.float32)],
        ),
        compiler_params=pltpu.CompilerParams(
            dimension_semantics=("parallel", "arbitrary"),
            vmem_limit_bytes=32 * 1024 * 1024,
        ),
    )(pred_cm, tgt)

    # Each split wrote its (already N-normalized) partial into lane 0 of its
    # own 128-lane slab and zeros elsewhere; one tiny XLA reduce combines them.
    return jnp.sum(partials)


def _reference(pred, target, *, classes, smoothing):
    confidence = 1.0 - smoothing
    logp = jax.nn.log_softmax(pred.astype(jnp.float32), axis=-1)
    true_dist = jnp.full_like(logp, smoothing / (classes - 1))
    true_dist = true_dist.at[jnp.arange(pred.shape[0]), target].set(confidence)
    return jnp.mean(jnp.sum(-true_dist * logp, axis=-1))


if __name__ == "__main__":
    key = jax.random.PRNGKey(0)
    k1, k2 = jax.random.split(key)

    # N deliberately not a multiple of 8/128 to exercise tail masking.
    N, CLASSES, SMOOTHING = 10, 3, 0.25
    pred = jax.random.normal(k1, (N, CLASSES), dtype=jnp.float32)
    target = jax.random.randint(k2, (N,), 0, CLASSES, dtype=jnp.int32)

    loss = label_smoothing_loss(pred, target, classes=CLASSES, smoothing=SMOOTHING)
    loss = jax.block_until_ready(loss)

    ref = _reference(pred, target, classes=CLASSES, smoothing=SMOOTHING)
    assert jnp.allclose(loss, ref, atol=1e-5, rtol=1e-5), (loss, ref)

    print("KERNEL_OK")
</pallas_src>

<mosaic_0001>
module attributes {stable_mosaic.version = 11 : i64} {
  func.func @_label_smoothing_kernel(%arg0: i32, %arg1: i32, %arg2: memref<3x128xf32, #tpu.memory_space<vmem>>, %arg3: memref<1x128xi32, #tpu.memory_space<vmem>>, %arg4: memref<1x128xf32, #tpu.memory_space<vmem>>, %arg5: memref<1x128xf32, #tpu.memory_space<vmem>>) attributes {dimension_semantics = [#tpu.dimension_semantics<parallel>, #tpu.dimension_semantics<arbitrary>], iteration_bounds = array<i64: 2, 1>, scalar_prefetch = 0 : i64, scratch_operands = 1 : i64, tpu.core_type = #tpu.core_type<tc>, window_params = [{transform_indices = @transform_0, window_bounds = array<i64: 3, 128>}, {transform_indices = @transform_1, window_bounds = array<i64: 1, 128>}, {transform_indices = @transform_2, window_bounds = array<i64: 1, 128>}]} {
    %c0_i32 = arith.constant 0 : i32
    %0 = arith.cmpi eq, %arg1, %c0_i32 : i32
    %1 = arith.extui %0 : i1 to i32
    %c0_i32_0 = arith.constant 0 : i32
    %2 = arith.cmpi ne, %1, %c0_i32_0 : i32
    scf.if %2 {
      %cst_21 = arith.constant 0.000000e+00 : f32
      %68 = vector.broadcast %cst_21 : f32 to vector<1x128xf32>
      %c0_22 = arith.constant 0 : index
      %c0_23 = arith.constant 0 : index
      %69 = vector.load %arg5[%c0_22, %c0_23] : memref<1x128xf32, #tpu.memory_space<vmem>>, vector<1x128xf32>
      tpu.vector_store %arg5[%c0_22, %c0_23], %68 {strides = array<i32>} : memref<1x128xf32, #tpu.memory_space<vmem>>, vector<1x128xf32>,
    } else {
    }
    %c0 = arith.constant 0 : index
    %c0_1 = arith.constant 0 : index
    %3 = vector.load %arg2[%c0, %c0_1] : memref<3x128xf32, #tpu.memory_space<vmem>>, vector<3x128xf32>
    %c0_2 = arith.constant 0 : index
    %c0_3 = arith.constant 0 : index
    %4 = vector.load %arg3[%c0_2, %c0_3] : memref<1x128xi32, #tpu.memory_space<vmem>>, vector<1x128xi32>
    %5 = vector.extract_strided_slice %3 {offsets = [0, 0], sizes = [1, 128], strides = [1, 1]} : vector<3x128xf32> to vector<1x128xf32>
    %6 = vector.extract_strided_slice %3 {offsets = [1, 0], sizes = [1, 128], strides = [1, 1]} : vector<3x128xf32> to vector<1x128xf32>
    %7 = arith.maximumf %5, %6 : vector<1x128xf32>
    %8 = vector.extract_strided_slice %3 {offsets = [2, 0], sizes = [1, 128], strides = [1, 1]} : vector<3x128xf32> to vector<1x128xf32>
    %9 = arith.maximumf %7, %8 : vector<1x128xf32>
    %10 = vector.broadcast %9 : vector<1x128xf32> to vector<3x128xf32>
    %11 = arith.subf %3, %10 : vector<3x128xf32>
    %cst = arith.constant 0.000000e+00 : f32
    %12 = vector.broadcast %cst : f32 to vector<1x128xf32>
    %cst_4 = arith.constant 0.000000e+00 : f32
    %13 = vector.broadcast %cst_4 : f32 to vector<1x128xf32>
    %cst_5 = arith.constant 0.000000e+00 : f32
    %14 = vector.broadcast %cst_5 : f32 to vector<1x128xf32>
    %15 = vector.extract_strided_slice %11 {offsets = [0, 0], sizes = [1, 128], strides = [1, 1]} : vector<3x128xf32> to vector<1x128xf32>
    %16 = math.exp %15 : vector<1x128xf32>
    %17 = arith.addf %12, %16 : vector<1x128xf32>
    %18 = arith.addf %13, %15 : vector<1x128xf32>
    %c0_i32_6 = arith.constant 0 : i32
    %19 = vector.broadcast %c0_i32_6 : i32 to vector<1x128xi32>
    %20 = arith.cmpi eq, %4, %19 : vector<1x128xi32>
    %cst_7 = arith.constant 0.000000e+00 : f32
    %21 = vector.broadcast %cst_7 : f32 to vector<1x128xf32>
    %22 = arith.select %20, %15, %21 : vector<1x128xi1>, vector<1x128xf32>
    %23 = arith.addf %14, %22 : vector<1x128xf32>
    %24 = vector.extract_strided_slice %11 {offsets = [1, 0], sizes = [1, 128], strides = [1, 1]} : vector<3x128xf32> to vector<1x128xf32>
    %25 = math.exp %24 : vector<1x128xf32>
    %26 = arith.addf %17, %25 : vector<1x128xf32>
    %27 = arith.addf %18, %24 : vector<1x128xf32>
    %c1_i32 = arith.constant 1 : i32
    %28 = vector.broadcast %c1_i32 : i32 to vector<1x128xi32>
    %29 = arith.cmpi eq, %4, %28 : vector<1x128xi32>
    %cst_8 = arith.constant 0.000000e+00 : f32
    %30 = vector.broadcast %cst_8 : f32 to vector<1x128xf32>
    %31 = arith.select %29, %24, %30 : vector<1x128xi1>, vector<1x128xf32>
    %32 = arith.addf %23, %31 : vector<1x128xf32>
    %33 = vector.extract_strided_slice %11 {offsets = [2, 0], sizes = [1, 128], strides = [1, 1]} : vector<3x128xf32> to vector<1x128xf32>
    %34 = math.exp %33 : vector<1x128xf32>
    %35 = arith.addf %26, %34 : vector<1x128xf32>
    %36 = arith.addf %27, %33 : vector<1x128xf32>
    %c2_i32 = arith.constant 2 : i32
    %37 = vector.broadcast %c2_i32 : i32 to vector<1x128xi32>
    %38 = arith.cmpi eq, %4, %37 : vector<1x128xi32>
    %cst_9 = arith.constant 0.000000e+00 : f32
    %39 = vector.broadcast %cst_9 : f32 to vector<1x128xf32>
    %40 = arith.select %38, %33, %39 : vector<1x128xi1>, vector<1x128xf32>
    %41 = arith.addf %32, %40 : vector<1x128xf32>
    %42 = math.log %35 : vector<1x128xf32>
    %cst_10 = arith.constant 3.000000e+00 : f32
    %43 = vector.broadcast %cst_10 : f32 to vector<1x128xf32>
    %44 = arith.mulf %43, %42 : vector<1x128xf32>
    %45 = arith.subf %36, %44 : vector<1x128xf32>
    %46 = arith.subf %41, %42 : vector<1x128xf32>
    %cst_11 = arith.constant -6.250000e-01 : f32
    %47 = vector.broadcast %cst_11 : f32 to vector<1x128xf32>
    %48 = arith.mulf %47, %46 : vector<1x128xf32>
    %cst_12 = arith.constant 1.250000e-01 : f32
    %49 = vector.broadcast %cst_12 : f32 to vector<1x128xf32>
    %50 = arith.mulf %49, %45 : vector<1x128xf32>
    %51 = arith.subf %48, %50 : vector<1x128xf32>
    %c1_i32_13 = arith.constant 1 : i32
    %52 = arith.muli %arg0, %c1_i32_13 : i32
    %53 = arith.addi %52, %arg1 : i32
    %c128_i32 = arith.constant 128 : i32
    %54 = arith.muli %53, %c128_i32 : i32
    %55 = tpu.iota {dimensions = array<i32: 1>} : vector<1x128xi32>
    %56 = vector.broadcast %54 : i32 to vector<1x128xi32>
    %57 = arith.addi %56, %55 : vector<1x128xi32>
    %c10_i32 = arith.constant 10 : i32
    %58 = vector.broadcast %c10_i32 : i32 to vector<1x128xi32>
    %59 = arith.cmpi slt, %57, %58 : vector<1x128xi32>
    %cst_14 = arith.constant 0.000000e+00 : f32
    %60 = vector.broadcast %cst_14 : f32 to vector<1x128xf32>
    %61 = arith.select %59, %51, %60 : vector<1x128xi1>, vector<1x128xf32>
    %c0_15 = arith.constant 0 : index
    %c0_16 = arith.constant 0 : index
    %62 = vector.load %arg5[%c0_15, %c0_16] : memref<1x128xf32, #tpu.memory_space<vmem>>, vector<1x128xf32>
    %63 = arith.addf %62, %61 : vector<1x128xf32>
    %c0_17 = arith.constant 0 : index
    %c0_18 = arith.constant 0 : index
    %64 = vector.load %arg5[%c0_17, %c0_18] : memref<1x128xf32, #tpu.memory_space<vmem>>, vector<1x128xf32>
    tpu.vector_store %arg5[%c0_17, %c0_18], %63 {strides = array<i32>} : memref<1x128xf32, #tpu.memory_space<vmem>>, vector<1x128xf32>,
    %c0_i32_19 = arith.constant 0 : i32
    %65 = arith.cmpi eq, %arg1, %c0_i32_19 : i32
    %66 = arith.extui %65 : i1 to i32
    %c0_i32_20 = arith.constant 0 : i32
    %67 = arith.cmpi ne, %66, %c0_i32_20 : i32
    scf.if %67 {
      %c0_21 = arith.constant 0 : index
      %c0_22 = arith.constant 0 : index
      %68 = vector.load %arg5[%c0_21, %c0_22] : memref<1x128xf32, #tpu.memory_space<vmem>>, vector<1x128xf32>
      %69 = vector.shape_cast %68 : vector<1x128xf32> to vector<1x1x128xf32>
      %cst_23 = arith.constant dense<0.000000e+00> : vector<1xf32>
      %70 = vector.multi_reduction <add>, %69, %cst_23 [1, 2] : vector<1x1x128xf32> to vector<1xf32>
      %71 = vector.shape_cast %70 : vector<1xf32> to vector<1x1x1xf32>
      %72 = vector.extract %71[0, 0, 0] : f32 from vector<1x1x1xf32>
      %cst_24 = arith.constant 1.000000e+01 : f32
      %73 = arith.divf %72, %cst_24 : f32
      %74 = tpu.iota {dimensions = array<i32: 1>} : vector<1x128xi32>
      %c0_i32_25 = arith.constant 0 : i32
      %75 = vector.broadcast %c0_i32_25 : i32 to vector<1x128xi32>
      %76 = arith.cmpi eq, %74, %75 : vector<1x128xi32>
      %cst_26 = arith.constant 0.000000e+00 : f32
      %77 = vector.broadcast %73 : f32 to vector<1x128xf32>
      %78 = vector.broadcast %cst_26 : f32 to vector<1x128xf32>
      %79 = arith.select %76, %77, %78 : vector<1x128xi1>, vector<1x128xf32>
      %c0_27 = arith.constant 0 : index
      %c0_28 = arith.constant 0 : index
      %80 = vector.load %arg4[%c0_27, %c0_28] : memref<1x128xf32, #tpu.memory_space<vmem>>, vector<1x128xf32>
      tpu.vector_store %arg4[%c0_27, %c0_28], %79 {strides = array<i32>} : memref<1x128xf32, #tpu.memory_space<vmem>>, vector<1x128xf32>,
    } else {
    }
    return
  }
  func.func @transform_0(%arg0: i32, %arg1: i32) -> (i32, i32) {
    %c1_i32 = arith.constant 1 : i32
    %0 = arith.muli %arg0, %c1_i32 : i32
    %1 = arith.addi %0, %arg1 : i32
    %c0_i32 = arith.constant 0 : i32
    %c0_i32_0 = arith.constant 0 : i32
    return %c0_i32, %1 : i32, i32
  }
  func.func @transform_1(%arg0: i32, %arg1: i32) -> (i32, i32) {
    %c1_i32 = arith.constant 1 : i32
    %0 = arith.muli %arg0, %c1_i32 : i32
    %1 = arith.addi %0, %arg1 : i32
    %c0_i32 = arith.constant 0 : i32
    %c0_i32_0 = arith.constant 0 : i32
    return %c0_i32, %1 : i32, i32
  }
  func.func @transform_2(%arg0: i32, %arg1: i32) -> (i32, i32) {
    %c0_i32 = arith.constant 0 : i32
    %c0_i32_0 = arith.constant 0 : i32
    return %c0_i32, %arg0 : i32, i32
  }
}

</mosaic_0001>

<bundles_post_ra>
// kernel: tpu_custom_call.1
= control target key start
LH: loop header
LB: loop body
LE: loop exit
PB: predicated region body
PF: predicated region fallthrough
CT: control target
= control target key end

     0   :  { %7 = vsyncpa [#allocation4], 0  ;;  %s808_s0 = inlined_call_operand.hbm [shape: f32[3,256], index: 0, kind: input, shape index: {}]   ;;  %s809_s1 = inlined_call_operand.hbm [shape: s32[1,256], index: 1, kind: input, shape index: {}]   ;;  %s810_s2 = inlined_call_operand.hbm [shape: f32[1,256], index: 2, kind: output, shape index: {}]  }
   0x1   :  { %9 = vsyncpa [#allocation4 + $0x1], 0 }
   0x2   :  { %10 = vsyncpa [#allocation7], 0 }
   0x3   :  { %12 = vsyncpa [#allocation7 + $0x1], 0 }
   0x4   :  { %13 = vsyncpa [#allocation5], 0 }
   0x5   :  { %15 = vsyncpa [#allocation5 + $0x1], 0  ;;  %s676_s9 = smov 0   ;;  %s678_s10 = smov 0  }
   0x6   :  { %s680_s11 = smov 0   ;;  %s682_s12 = smov 0  }
   0x7   :  { %s684_s13 = smov 0   ;;  %s686_s14 = smov 0  }
   0x8 LB: > { %s421_s15 = sadd.s32 4294967295, %s657_s14   ;;  %s422_s16 = sadd.s32 4294967294, %s657_s14   ;;  %s657_s14 = sphi %s686_s14, %s21_s14   ;;  %s653_s13 = sphi %s684_s13, %s819_s13   ;;  %s649_s12 = sphi %s682_s12, %s818_s12   ;;  %s645_s11 = sphi %s680_s11, %s817_s11   ;;  %s641_s10 = sphi %s678_s10, %s816_s10   ;;  %s637_s9 = sphi %s676_s9, %s815_s9  }
   0x9   : > { %s33_s17 = sadd.s32 1, %s653_s13  ;;  %s42_s18 = sadd.s32 1, %s645_s11 }
   0xa   : > { %p35_p0 = scmp.ge.s32.totalorder %s33_s17, 2  ;;  %p49_p1 = scmp.ne.s32.totalorder %s645_s11, %s641_s10 }
   0xb   : > { %p50_p2 = scmp.eq.s32.totalorder %s657_s14, 0  ;;  %p55_p3 = scmp.ne.s32.totalorder %s641_s10, %s637_s9 }
   0xc   : > { %s821_s17 = smov (%p35_p0, %s33_s17), 0  ;;  %p56_p5 = scmp.eq.s32.totalorder %s421_s15, 0 }
   0xd   : > { %p717_p4 = por %p50_p2, %p49_p1  ;;  %s39_s20 = ssub.s32 %s653_s13, %s821_s17 }
   0xe   : > { %p107_p6 = scmp.eq.s32.totalorder %s421_s15, 1  ;;  %p40_p7 = scmp.eq.s32.totalorder %s39_s20, 0 }
   0xf   : > { %p723_p8 = por %p56_p5, %p55_p3  ;;  %p113_p10 = scmp.eq.s32.totalorder %s422_s16, 1 }
  0x10   : > { %p727_p9 = por %p107_p6, %p49_p1  ;;  %p424_p12 = scmp.ge.s32.totalorder %s657_s14, 2 }
  0x11   : > { %s732_s23 = scalar_select %p40_p7, %s645_s11, %s42_s18  }
  0x12   : > { %p734_p11 = por %p113_p10, %p55_p3  ;;  %p453_p13 = scmp.lt.s32.totalorder %s657_s14, 2 }
  0x13   : > { %s133_s25 = sand.u32 1, %s645_s11   ;;  %s426_s27 = sshll.u32 %s653_s13, 2 }
  0x14   : > { %s425_s26 = sshll.u32 %s133_s25, 2  ;;  %s142_s30 = scalar_lea.hbm %s808_s0, %s426_s27 }
  0x15   : > { %s137_s3 = scalar_lea.vmem [#allocation3], %s425_s26  ;;  %s144_s5 = sshll.u32 %s142_s30, 4  ;;  %s145_s5 = int_to_ptr.hbm [resolvable:$true] %s144_s5 }
  0x16   : > { %s146_s4 = sshll.u32 %s137_s3, 4  ;;  %p443_p0 = pnand %p453_p13, %p717_p4  ;;  %s147_s4 = int_to_ptr.vmem [resolvable:$true] %s146_s4 }
  0x17   : > { %p427_p1 = scmp.ge.s32.totalorder %s657_s14, 1  ;;  %p169_p2 = scmp.lt.s32.totalorder %s657_s14, 3 }
  0x18   : > { %s134_s6 = scalar_lea.sflag [#allocation4], %s133_s25  ;;  %s160_s15 = scalar_lea.hbm %s809_s1, %s653_s13 }
  0x19   : > { %445 = dma.hbm_to_vmem [thread:$0]  (!%p443_p0), %s145_s5, 64, %s147_s4, %s134_s6  }
  0x1a   : > { %p170_p3 = pnand %p427_p1, %p169_p2  ;;  %s156_s16 = scalar_lea.vmem [#allocation6], %s133_s25 }
  0x1b   : > { %s164_s18 = sshll.u32 %s156_s16, 4  ;;  %s162_s20 = sshll.u32 %s160_s15, 4  ;;  %s165_s18 = int_to_ptr.vmem [resolvable:$true] %s164_s18  ;;  %s163_s20 = int_to_ptr.hbm [resolvable:$true] %s162_s20 }
  0x1c   : > { %s154_s26 = scalar_lea.sflag [#allocation7], %s133_s25  ;;  %173 = sbr.rel (%p170_p3) target bundleno = 277 (0x115), region = 28 }
  0x1d   : > { %448 = dma.hbm_to_vmem [thread:$0]  (!%p443_p0), %s163_s20, 16, %s165_s18, %s154_s26  }
  0x1e   : > { %s754_s19 = sand.u32 (!%p170_p3), 1, %s641_s10  }
  0x1f   : > { %s428_s27 = sshll.u32 (!%p170_p3), %s754_s19, 2  ;;  %s176_s28 = scalar_lea.sflag (!%p170_p3), [#allocation4], %s754_s19 }
  0x20   : > { %s179_s29 = scalar_lea.vmem (!%p170_p3), [#allocation3], %s428_s27 }
  0x21   : > { %624 = dma.done.wait (%p723_p8), %s176_s28, 64  }
  0x22   : > { %626 = vsyncadd (%p723_p8), %s176_s28, 4294967232  ;;  %s186_s25 = scalar_lea.sflag [#allocation7], %s754_s19  ;;  %s188_s30 = scalar_lea.vmem [#allocation6], %s754_s19 }
  0x23   : > { %628 = dma.done.wait (%p723_p8), %s186_s25, 16  }
  0x24   : > { %630 = vsyncadd (%p723_p8), %s186_s25, 4294967280  ;;  %v659_v0 = vmov 0.0   ;;  %v220_v1 = vld [vmem:[%s179_s29] sm:$0x7]  ;;  %v221_v9 = vld [vmem:[%s188_s30] sm:$0x1]  ;;  %v276_v22 = vlaneseq  ;;  %s322_s5 = scalar_lea.hbm %s810_s2, %s649_s12 }
  0x25   : > { %219 = vst [vmem:[#allocation2] sm:$0x1] %v659_v0  ;;  %v223_v2 = vrot.slane %v220_v1, 1  ;;  %v226_v3 = vrot.slane %v220_v1, 2  ;;  %vm235_vm0 = vcmp.eq.s32.totalorder %v221_v9, 0  ;;  %vm246_vm1 = vcmp.eq.s32.totalorder %v221_v9, 1 }
  0x26   : > { %vm259_vm2 = vcmp.eq.s32.totalorder %v221_v9, 2  ;;  %s429_s21 = sshll.u32 %s649_s12, 7  ;;  %v277_v27 = vand.u32 127, %v276_v22  ;;  %vm289_vm4 = vcmask 1040384   ;;  %v660_v43 = vmov 10.0   ;;  %s212_s7 = scalar_lea.vmem [#allocation8], %s754_s19 }
  0x27   : > { %v225_v4 = vmax.f32 %v220_v1, %v223_v2  ;;  %v278_v30 = vstv %s429_s21  ;;  %s324_s8 = sshll.u32 %s212_s7, 4  ;;  %s326_s16 = sshll.u32 %s322_s5, 4  ;;  %s325_s8 = int_to_ptr.vmem [resolvable:$true] %s324_s8  ;;  %s327_s16 = int_to_ptr.hbm [resolvable:$true] %s326_s16 }
  0x28   : > { %v279_v33 = vadd.s32 %v278_v30, %v277_v27  ;;  %vm309_vm6 = vcmp.eq.s32.totalorder %v277_v27, 0  ;;  %s314_s20 = scalar_lea.sflag [#allocation5], %s754_s19  ;;  %s585_s26 = sshra.s32 %s327_s16, 4  ;;  %s586_s26 = int_to_ptr.hbm [resolvable:$true] %s585_s26 }
  0x29   : > { %v228_v5 = vmax.f32 %v225_v4, %v226_v3  ;;  %s587_s27 = scalar_lea.hbm %s586_s26, 1  ;;  %s591_s29 = scalar_lea.hbm %s810_s2, 2 }
  0x2a   : > { %vm280_vm3 = vcmp.lt.s32.totalorder %v279_v33, 10  ;;  %p588_p4 = scmp.ne.s32.totalorder %s586_s26, %s587_s27  ;;  %p592_p7 = scmp.lt.s32.totalorder %s586_s26, %s810_s2 }
  0x2b   : > { %v229_v6 = vperm.slane %v228_v5, 0  ;;  %p593_p8 = scmp.lt.s32.totalorder %s591_s29, %s587_s27 }
  0x2c   : > { %v282_v38 = vld [vmem:[#allocation2] sm:$0x1]  ;;  %p589_p5 = pnand %p588_p4, %p727_p9 }
  0x2d   : > { %v230_v7 = vsub.f32 %v220_v1, %v229_v6  ;;  %p594_p10 = por %p593_p8, %p592_p7 }
  0x2e   : > { %p590_p6 = pneg %p589_p5 }
  0x2f   : > { %247 = vst [vmem:[#allocation1] sm:$0xff] %v230_v7  ;;  %v231_v8 = vmul.f32 1.442695, %v230_v7  ;;  %v236_v15 = vsel %vm235_vm0, %v230_v7, 0.0  ;;  %v243_v18 = vrot.slane %v230_v7, 1  ;;  %v256_v24 = vrot.slane %v230_v7, 2 }
  0x30   : > { %p595_p13 = pnand %p594_p10, %p590_p6 }
  0x31   : > { %505 = vpow2.f32 %v231_v8  ;;  %v245_v23 = vadd.f32 %v243_v18, %v230_v7 }
  0x33   : > { %v258_v28 = vadd.f32 %v256_v24, %v245_v23 }
  0x36   : > { %v249_v10 = vld [vmem:[#allocation1 + $0x1] ss:$9 sm:$0xff] }
  0x37   : > { %v506_v11 = vpop.eup %505  ;;  %260 = vst [vmem:[#allocation1] sm:$0xff] %v230_v7  ;;  %v251_v16 = vsel %vm246_vm1, %v249_v10, 0.0 }
  0x38   : > { %v239_v12 = vrot.slane %v506_v11, 1  ;;  %v253_v13 = vrot.slane %v506_v11, 2  ;;  %v252_v20 = vadd.f32 %v251_v16, %v236_v15 }
  0x3a   : > { %v241_v14 = vadd.f32 %v506_v11, %v239_v12 }
  0x3c   : > { %v255_v17 = vadd.f32 %v253_v13, %v241_v14 }
  0x3e   : > { %v262_v19 = vld [vmem:[#allocation1 + $0x2] ss:$9 sm:$0xff]  ;;  %507 = vlog2.f32 %v255_v17 }
  0x3f   : > { %v264_v21 = vsel %vm259_vm2, %v262_v19, 0.0  ;;  %509 = vrcp.f32 %v660_v43 }
  0x40   : > { %v265_v25 = vadd.f32 %v264_v21, %v252_v20 }
  0x44   : > { %v508_v26 = vpop.eup %507 }
  0x45   : > { %v267_v29 = vmul.f32 0.6931472, %v508_v26  ;;  %v510_v44 = vpop.eup %509 }
  0x46   : > { %v301_v45 = vmul.f32 10.0, %v510_v44  ;;  %vm305_vm5 = vweird.f32 %v510_v44 }
  0x47   : > { %v268_v31 = vmul.f32 3.0, %v267_v29  ;;  %v270_v32 = vsub.f32 %v265_v25, %v267_v29 }
  0x48   : > { %v302_v46 = vsub.f32 1.0, %v301_v45 }
  0x49   : > { %v269_v34 = vsub.f32 %v258_v28, %v268_v31  ;;  %v271_v35 = vmul.f32 -0.625, %v270_v32 }
  0x4a   : > { %v303_v50 = vmul.f32 %v510_v44, %v302_v46 }
  0x4b   : > { %v272_v36 = vmul.f32 0.125, %v269_v34 }
  0x4c   : > { %v304_v53 = vadd.f32 %v510_v44, %v303_v50 }
  0x4d   : > { %v273_v37 = vsub.f32 %v271_v35, %v272_v36 }
  0x4e   : > { %v306_v56 = vsel %vm305_vm5, %v510_v44, %v304_v53 }
  0x4f   : > { %v281_v39 = vsel %vm280_vm3, %v273_v37, 0.0 }
  0x50   : > { %v283_v40 = vadd.f32 %v282_v38, %v281_v39 }
  0x52   : > { %284 = vst [vmem:[#allocation2] sm:$0x1] %v283_v40 }
  0x59   : > { %v288_v41 = vld [vmem:[#allocation2] sm:$0x1] }
  0x5a   : > { %v290_v42 = vsel %vm289_vm4, %v288_v41, 0.0 }
  0x5b   : > { %291 = vadd.xlane.f32.xlu0 %v290_v42 }
  0xce   : > { %v292_v47 = vpop.xlane.xlu0 %291 }
  0xcf   : > { %v293_v48 = vrot.slane %v292_v47, 4 }
  0xd1   : > { %v294_v49 = vadd.f32 %v293_v48, %v292_v47 }
  0xd3   : > { %v295_v51 = vrot.slane %v294_v49, 2 }
  0xd5   : > { %v296_v52 = vadd.f32 %v295_v51, %v294_v49 }
  0xd7   : > { %v297_v54 = vrot.slane %v296_v52, 1 }
  0xd9   : > { %v298_v55 = vadd.f32 %v297_v54, %v296_v52 }
  0xdb   : > { %432 = vpush %v298_v55 }
  0xdc   : > { %434 = vpush %v306_v56 }
 0x10c   : > { %s433_s6 = spop %432 }
 0x10d   : > { %s435_s15 = spop %434 }
 0x10e   : > { %s308_s18 = smul.f32 %s435_s15, %s433_s6 }
 0x110   : > { %v310_v57 = vstv %s308_s18 }
 0x111   : > { %v311_v58 = vsel %vm309_vm6, %v310_v57, 0.0 }
 0x112   : > { %312 = vst [vmem:[%s212_s7] sm:$0x1] %v311_v58 }
 0x113   : > { %598 = shalt.err (!%p595_p13)
}
 0x114   : > { %440 = dma.vmem_to_hbm [thread:$0]  (%p727_p9), %s325_s8, 16, %s327_s16, %s314_s20  }
 0x115 PF: > { %s338_s19 = sand.u32 1, %s637_s9   ;;  %p450_p0 = pnand %p424_p12, %p734_p11 }
 0x116   : > { %s339_s21 = scalar_lea.sflag [#allocation5], %s338_s19 }
 0x117   : > { %p451_p1 = pneg %p450_p0 }
 0x119   : > { %632 = dma.done.wait (%p451_p1), %s339_s21, 16  }
 0x11a   : > { %634 = vsyncadd (%p451_p1), %s339_s21, 4294967280  ;;  %s21_s14 = sadd.s32 1, %s657_s14   ;;  %s815_s9 = smov %s641_s10 }
 0x11b   : > { %p18_p2 = scmp.ge.s32.totalorder %s21_s14, 4   ;;  %s816_s10 = smov %s645_s11 }
 0x11c   : > { %s817_s11 = smov %s732_s23  ;;  %s818_s12 = smov %s653_s13 }
 0x11d   : > { %s819_s13 = smov %s821_s17  ;;  %20 = sbr.rel (!%p18_p2) target bundleno = 8 (0x8), region = 96 }
 0x122   :  { %344 = vsyncpa [#allocation4], 1 }
 0x123   :  { %346 = vsyncpa [#allocation4 + $0x1], 1 }
 0x124   :  { %347 = vsyncpa [#allocation7], 1 }
 0x125   :  { %349 = vsyncpa [#allocation7 + $0x1], 1 }
 0x126   :  { %350 = vsyncpa [#allocation5], 1 }
 0x127   :  { %352 = vsyncpa [#allocation5 + $0x1], 1 }

</bundles_post_ra>
